<compile_context>
chip_gen: v6e
topology: v6e:2x2x1
jax: 0.10.0
libtpu: 0.0.40
codegen_flags: <defaults>
</compile_context>

<pallas_src>
import jax
import jax.numpy as jnp
from jax import lax
from jax.experimental import pallas as pl
from jax.experimental.pallas import tpu as pltpu


_INV_SQRT2 = 0.7071067811865476


def _ffn_kernel(x_ref, w1t_ref, b1_ref, w2t_ref, b2_ref, o_ref, acc_ref):
    h_idx = pl.program_id(1)

    @pl.when(h_idx == 0)
    def _():
        acc_ref[...] = jnp.zeros_like(acc_ref)

    x = x_ref[...].astype(jnp.bfloat16)          # (tm, F)  bf16 -> MXU
    w1t = w1t_ref[...]                           # (F, th)  bf16
    w2t = w2t_ref[...]                           # (th, F)  bf16
    b1 = b1_ref[...]                             # (1, th)  f32

    # expand: partial Linear(F -> th slice of 4F), f32 accumulation on MXU.
    h = jnp.dot(x, w1t, preferred_element_type=jnp.float32) + b1

    # exact GELU (matches torch.nn.GELU default), kept in f32.
    h = 0.5 * h * (1.0 + lax.erf(h * _INV_SQRT2))

    # proj: partial Linear(th slice of 4F -> F), accumulated over the H axis.
    acc_ref[...] += jnp.dot(h.astype(jnp.bfloat16), w2t,
                            preferred_element_type=jnp.float32)

    @pl.when(h_idx == pl.num_programs(1) - 1)
    def _():
        # Dropout(p=0.0) is identity.
        # TODO(synk): training-mode dropout (p>0) not implemented.
        o_ref[...] = (acc_ref[...] + b2_ref[...]).astype(o_ref.dtype)


def prepare_ffn_params(w1, b1, w2, b2):
    """One-time parameter prep (hoisted out of the per-call path):
    transpose weights for row-major matmuls and cast to bf16 for the MXU;
    biases stay f32, reshaped to 2D for a TPU-friendly layout."""
    H, F = w1.shape
    assert w2.shape == (F, H) and b1.shape == (H,) and b2.shape == (F,)
    w1t = jnp.asarray(w1, jnp.float32).T.astype(jnp.bfloat16)   # (F, H)
    w2t = jnp.asarray(w2, jnp.float32).T.astype(jnp.bfloat16)   # (H, F)
    b1_2d = jnp.asarray(b1, jnp.float32).reshape(1, H)
    b2_2d = jnp.asarray(b2, jnp.float32).reshape(1, F)
    return w1t, b1_2d, w2t, b2_2d


def _pick_tile(n, candidates):
    for c in candidates:
        if n % c == 0:
            return c
    return n


def feed_forward_block(x, w1t, b1_2d, w2t, b2_2d, *, tm=None, th=None):
    """x: (M, F); w1t: (F, H) bf16; b1_2d: (1, H); w2t: (H, F) bf16; b2_2d: (1, F)."""
    M, F = x.shape
    H = w1t.shape[1]
    assert w1t.shape == (F, H) and w2t.shape == (H, F)
    assert b1_2d.shape == (1, H) and b2_2d.shape == (1, F)

    # Explicit row tile: big enough to pipeline and amortize per-step overhead,
    # small enough to leave VMEM for the weight tiles; >=2 grid steps when
    # possible so v7x's second TensorCore gets work on the "parallel" axis.
    if tm is None:
        tm = _pick_tile(M, (512, 256, 128, 64, 32, 16, 8))
    if th is None:
        th = _pick_tile(H, (2048, 1024, 512, 256, 128))
    assert M % tm == 0 and H % th == 0

    x_bytes = jnp.dtype(x.dtype).itemsize
    out_bytes = x_bytes
    # Double-buffered pipelined inputs/outputs + f32 accumulator, with headroom.
    vmem_est = (2 * tm * F * x_bytes            # x tiles
                + 2 * F * th * 2                # W1^T tiles (bf16)
                + 2 * th * 4                    # b1 tiles
                + 2 * th * F * 2                # W2^T tiles (bf16)
                + F * 4                         # b2 (tiny, effectively resident)
                + 2 * tm * F * out_bytes        # out tiles
                + tm * F * 4)                   # accumulator scratch
    vmem_limit = max(16 * 1024 * 1024,
                     min(int(vmem_est * 1.5) + (2 << 20), 96 * 1024 * 1024))

    grid = (M // tm, H // th)
    return pl.pallas_call(
        _ffn_kernel,
        out_shape=jax.ShapeDtypeStruct((M, F), x.dtype),
        grid_spec=pltpu.PrefetchScalarGridSpec(
            num_scalar_prefetch=0,
            grid=grid,
            in_specs=[
                pl.BlockSpec((tm, F), lambda i, j: (i, 0)),    # x row-block
                pl.BlockSpec((F, th), lambda i, j: (0, j)),    # W1^T hidden tile
                pl.BlockSpec((1, th), lambda i, j: (0, j)),    # b1 hidden tile
                pl.BlockSpec((th, F), lambda i, j: (j, 0)),    # W2^T hidden tile
                pl.BlockSpec((1, F), lambda i, j: (0, 0)),     # b2 (tiny)
            ],
            out_specs=pl.BlockSpec((tm, F), lambda i, j: (i, 0)),
            scratch_shapes=[pltpu.VMEM((tm, F), jnp.float32)],
        ),
        compiler_params=pltpu.CompilerParams(
            dimension_semantics=("parallel", "arbitrary"),
            vmem_limit_bytes=vmem_limit,
        ),
    )(x, w1t, b1_2d, w2t, b2_2d)


def _ref_ffn(x, w1, b1, w2, b2):
    h = x @ w1.T + b1
    h = 0.5 * h * (1.0 + lax.erf(h / jnp.sqrt(2.0)))
    return h @ w2.T + b2


if __name__ == "__main__":
    # Small shapes consistent with the module: (batch, seq, n_features).
    batch, seq, n_features = 2, 8, 32
    scale_factor = 4
    hidden = n_features * scale_factor     # 128
    M = batch * seq                        # 16 token rows

    key = jax.random.PRNGKey(0)
    kx, k1, k2, k3, k4 = jax.random.split(key, 5)

    x = jax.random.normal(kx, (batch, seq, n_features), dtype=jnp.float32)

    # Deterministic parameter init (shapes per nn.Linear in __init__).
    bound1 = 1.0 / jnp.sqrt(n_features)
    w1 = jax.random.uniform(k1, (hidden, n_features), jnp.float32, -bound1, bound1)
    b1 = jax.random.uniform(k2, (hidden,), jnp.float32, -bound1, bound1)
    bound2 = 1.0 / jnp.sqrt(hidden)
    w2 = jax.random.uniform(k3, (n_features, hidden), jnp.float32, -bound2, bound2)
    b2 = jax.random.uniform(k4, (n_features,), jnp.float32, -bound2, bound2)

    # One-time param prep (transpose + bf16 cast hoisted out of the call path).
    params = prepare_ffn_params(w1, b1, w2, b2)

    x2d = x.reshape(M, n_features)
    out = feed_forward_block(x2d, *params)
    out = jax.block_until_ready(out)
    out = out.reshape(batch, seq, n_features)

    ref = _ref_ffn(x2d, w1, b1, w2, b2).reshape(batch, seq, n_features)
    assert out.shape == (batch, seq, n_features)
    # bf16 MXU inputs -> compare against the f32 reference at bf16-level tolerance.
    assert jnp.allclose(out, ref, atol=2e-2, rtol=2e-2), "mismatch vs reference"

    print("KERNEL_OK")
</pallas_src>

<mosaic_0001>
module attributes {stable_mosaic.version = 11 : i64} {
  func.func @_ffn_kernel(%arg0: i32, %arg1: i32, %arg2: memref<16x32xf32, #tpu.memory_space<vmem>>, %arg3: memref<32x128xbf16, #tpu.memory_space<vmem>>, %arg4: memref<1x128xf32, #tpu.memory_space<vmem>>, %arg5: memref<128x32xbf16, #tpu.memory_space<vmem>>, %arg6: memref<1x32xf32, #tpu.memory_space<vmem>>, %arg7: memref<16x32xf32, #tpu.memory_space<vmem>>, %arg8: memref<16x32xf32, #tpu.memory_space<vmem>>) attributes {dimension_semantics = [#tpu.dimension_semantics<parallel>, #tpu.dimension_semantics<arbitrary>], iteration_bounds = array<i64: 1, 1>, scalar_prefetch = 0 : i64, scratch_operands = 1 : i64, tpu.core_type = #tpu.core_type<tc>, window_params = [{transform_indices = @transform_0, window_bounds = array<i64: 16, 32>}, {transform_indices = @transform_1, window_bounds = array<i64: 32, 128>}, {transform_indices = @transform_2, window_bounds = array<i64: 1, 128>}, {transform_indices = @transform_3, window_bounds = array<i64: 128, 32>}, {pipeline_mode = #tpu.pipeline_mode<synchronous>, transform_indices = @transform_4, window_bounds = array<i64: 1, 32>}, {transform_indices = @transform_5, window_bounds = array<i64: 16, 32>}]} {
    %c0_i32 = arith.constant 0 : i32
    %0 = arith.cmpi eq, %arg1, %c0_i32 : i32
    %1 = arith.extui %0 : i1 to i32
    %c0_i32_0 = arith.constant 0 : i32
    %2 = arith.cmpi ne, %1, %c0_i32_0 : i32
    scf.if %2 {
      %cst_18 = arith.constant 0.000000e+00 : f32
      %27 = vector.broadcast %cst_18 : f32 to vector<16x32xf32>
      %c0_19 = arith.constant 0 : index
      %c0_20 = arith.constant 0 : index
      %28 = vector.load %arg8[%c0_19, %c0_20] : memref<16x32xf32, #tpu.memory_space<vmem>>, vector<16x32xf32>
      tpu.vector_store %arg8[%c0_19, %c0_20], %27 {strides = array<i32>} : memref<16x32xf32, #tpu.memory_space<vmem>>, vector<16x32xf32>,
    } else {
    }
    %c0 = arith.constant 0 : index
    %c0_1 = arith.constant 0 : index
    %3 = vector.load %arg2[%c0, %c0_1] : memref<16x32xf32, #tpu.memory_space<vmem>>, vector<16x32xf32>
    %4 = arith.truncf %3 : vector<16x32xf32> to vector<16x32xbf16>
    %c0_2 = arith.constant 0 : index
    %c0_3 = arith.constant 0 : index
    %5 = vector.load %arg3[%c0_2, %c0_3] : memref<32x128xbf16, #tpu.memory_space<vmem>>, vector<32x128xbf16>
    %c0_4 = arith.constant 0 : index
    %c0_5 = arith.constant 0 : index
    %6 = vector.load %arg5[%c0_4, %c0_5] : memref<128x32xbf16, #tpu.memory_space<vmem>>, vector<128x32xbf16>
    %c0_6 = arith.constant 0 : index
    %c0_7 = arith.constant 0 : index
    %7 = vector.load %arg4[%c0_6, %c0_7] : memref<1x128xf32, #tpu.memory_space<vmem>>, vector<1x128xf32>
    %cst = arith.constant dense<0.000000e+00> : vector<16x128xf32>
    %8 = tpu.matmul %4, %5, %cst {dimension_numbers = #tpu.dot_dimension_numbers<[1], [0], [0], [1], [0, 0, 1, 1], [], []>} : vector<16x32xbf16>, vector<32x128xbf16>, vector<16x128xf32> -> vector<16x128xf32>
    %9 = vector.broadcast %7 : vector<1x128xf32> to vector<16x128xf32>
    %10 = arith.addf %8, %9 : vector<16x128xf32>
    %cst_8 = arith.constant 5.000000e-01 : f32
    %11 = vector.broadcast %cst_8 : f32 to vector<16x128xf32>
    %12 = arith.mulf %11, %10 : vector<16x128xf32>
    %cst_9 = arith.constant 0.707106769 : f32
    %13 = vector.broadcast %cst_9 : f32 to vector<16x128xf32>
    %14 = arith.mulf %10, %13 : vector<16x128xf32>
    %15 = math.erf %14 : vector<16x128xf32>
    %cst_10 = arith.constant 1.000000e+00 : f32
    %16 = vector.broadcast %cst_10 : f32 to vector<16x128xf32>
    %17 = arith.addf %16, %15 : vector<16x128xf32>
    %18 = arith.mulf %12, %17 : vector<16x128xf32>
    %c0_11 = arith.constant 0 : index
    %c0_12 = arith.constant 0 : index
    %19 = vector.load %arg8[%c0_11, %c0_12] : memref<16x32xf32, #tpu.memory_space<vmem>>, vector<16x32xf32>
    %20 = arith.truncf %18 : vector<16x128xf32> to vector<16x128xbf16>
    %cst_13 = arith.constant dense<0.000000e+00> : vector<16x32xf32>
    %21 = tpu.matmul %20, %6, %cst_13 {dimension_numbers = #tpu.dot_dimension_numbers<[1], [0], [0], [1], [0, 0, 1, 1], [], []>} : vector<16x128xbf16>, vector<128x32xbf16>, vector<16x32xf32> -> vector<16x32xf32>
    %22 = arith.addf %19, %21 : vector<16x32xf32>
    %c0_14 = arith.constant 0 : index
    %c0_15 = arith.constant 0 : index
    %23 = vector.load %arg8[%c0_14, %c0_15] : memref<16x32xf32, #tpu.memory_space<vmem>>, vector<16x32xf32>
    tpu.vector_store %arg8[%c0_14, %c0_15], %22 {strides = array<i32>} : memref<16x32xf32, #tpu.memory_space<vmem>>, vector<16x32xf32>,
    %c0_i32_16 = arith.constant 0 : i32
    %24 = arith.cmpi eq, %arg1, %c0_i32_16 : i32
    %25 = arith.extui %24 : i1 to i32
    %c0_i32_17 = arith.constant 0 : i32
    %26 = arith.cmpi ne, %25, %c0_i32_17 : i32
    scf.if %26 {
      %c0_18 = arith.constant 0 : index
      %c0_19 = arith.constant 0 : index
      %27 = vector.load %arg8[%c0_18, %c0_19] : memref<16x32xf32, #tpu.memory_space<vmem>>, vector<16x32xf32>
      %c0_20 = arith.constant 0 : index
      %c0_21 = arith.constant 0 : index
      %28 = vector.load %arg6[%c0_20, %c0_21] : memref<1x32xf32, #tpu.memory_space<vmem>>, vector<1x32xf32>
      %29 = vector.broadcast %28 : vector<1x32xf32> to vector<16x32xf32>
      %30 = arith.addf %27, %29 : vector<16x32xf32>
      %c0_22 = arith.constant 0 : index
      %c0_23 = arith.constant 0 : index
      %31 = vector.load %arg7[%c0_22, %c0_23] : memref<16x32xf32, #tpu.memory_space<vmem>>, vector<16x32xf32>
      tpu.vector_store %arg7[%c0_22, %c0_23], %30 {strides = array<i32>} : memref<16x32xf32, #tpu.memory_space<vmem>>, vector<16x32xf32>,
    } else {
    }
    return
  }
  func.func @transform_0(%arg0: i32, %arg1: i32) -> (i32, i32) {
    %c0_i32 = arith.constant 0 : i32
    %c0_i32_0 = arith.constant 0 : i32
    return %arg0, %c0_i32 : i32, i32
  }
  func.func @transform_1(%arg0: i32, %arg1: i32) -> (i32, i32) {
    %c0_i32 = arith.constant 0 : i32
    %c0_i32_0 = arith.constant 0 : i32
    return %c0_i32, %arg1 : i32, i32
  }
  func.func @transform_2(%arg0: i32, %arg1: i32) -> (i32, i32) {
    %c0_i32 = arith.constant 0 : i32
    %c0_i32_0 = arith.constant 0 : i32
    return %c0_i32, %arg1 : i32, i32
  }
  func.func @transform_3(%arg0: i32, %arg1: i32) -> (i32, i32) {
    %c0_i32 = arith.constant 0 : i32
    %c0_i32_0 = arith.constant 0 : i32
    return %arg1, %c0_i32 : i32, i32
  }
  func.func @transform_4(%arg0: i32, %arg1: i32) -> (i32, i32) {
    %c0_i32 = arith.constant 0 : i32
    %c0_i32_0 = arith.constant 0 : i32
    %c0_i32_1 = arith.constant 0 : i32
    return %c0_i32, %c0_i32_0 : i32, i32
  }
  func.func @transform_5(%arg0: i32, %arg1: i32) -> (i32, i32) {
    %c0_i32 = arith.constant 0 : i32
    %c0_i32_0 = arith.constant 0 : i32
    return %arg0, %c0_i32 : i32, i32
  }
}

</mosaic_0001>

<bundles_post_ra>
// kernel: tpu_custom_call.1
= control target key start
LH: loop header
LB: loop body
LE: loop exit
PB: predicated region body
PF: predicated region fallthrough
CT: control target
= control target key end

     0   :  { %v348_v1 = vmov 0.0   ;;  %vm349_vm0 = vmmov 0   ;;  %vm26_vm1 = vcmask 261120   ;;  %s435_s0 = inlined_call_operand.vmem [shape: f32[16,32], index: 0, kind: input, shape index: {}]   ;;  %s436_s1 = inlined_call_operand.vmem [shape: bf16[32,128], index: 1, kind: input, shape index: {}]   ;;  %s437_s2 = inlined_call_operand.vmem [shape: f32[1,128], index: 2, kind: input, shape index: {}]   ;;  %s438_s3 = inlined_call_operand.vmem [shape: bf16[128,32], index: 3, kind: input, shape index: {}]   ;;  %s439_s4 = inlined_call_operand.vmem [shape: f32[1,32], index: 4, kind: input, shape index: {}]   ;;  %s440_s5 = inlined_call_operand.hbm [shape: f32[16,32], index: 5, kind: output, shape index: {}]  }
   0x1   :  { %v312_v0 = vld [vmem:[%s436_s1 + $0x8] sm:$0xff]   ;;  %279 = vmatprep.subr.bf16.mxu0 %v348_v1  ;;  %v313_v2 = vld [vmem:[%s436_s1] sm:$0xff]   ;;  %287 = vmatprep.subr.bf16.mxu1 %v348_v1  ;;  %27 = vst.msk [vmem:[#allocation2] sm:$0xff] %vm26_vm1, %v348_v1  ;;  %28 = vst.msk [vmem:[#allocation2 + $0x8] sm:$0xff] %vm26_vm1, %v348_v1 }
   0x2   :  { %280 = vmatpush3.bf16.msra.mxu0 %v312_v0  ;;  %283 = vmatprep.mubr.msk.bf16.mxu0 %vm349_vm0, %v348_v1  ;;  %v29_v3 = vld [vmem:[%s435_s0] sm:$0xff]  ;;  %v30_v4 = vld [vmem:[%s435_s0 + $0x8] sm:$0xff]  ;;  %v314_v5 = vld [vmem:[%s438_s3 + $0x38] sm:$0xff]  }
   0x3   :  { %281 = vmatprep.subr.bf16.mxu0 %v348_v1  ;;  %303 = vmatprep.mubr.msk.bf16.mxu1 %vm349_vm0, %v348_v1  ;;  %v31_v6 = vpack.c.bf16 %v30_v4, %v29_v3 }
   0x4   :  { %288 = vmatpush3.bf16.msra.mxu1 %v314_v5 }
   0x5   :  { %289 = vmatprep.subr.bf16.mxu1 %v348_v1 }
   0x6   :  { %282 = vmatpush3.bf16.msra.mxu0 %v313_v2 }
   0x7   :  { %10 = vsyncpa [#allocation4], 0  ;;  %v315_v7 = vld [vmem:[%s438_s3 + $0x30] sm:$0xff]   ;;  %v316_v8 = vld [vmem:[%s438_s3 + $0x28] sm:$0xff]   ;;  %s350_s17 = smov [#allocation3]  }
   0x8   :  { %290 = vmatpush3.bf16.msra.mxu1 %v315_v7  ;;  %v317_v9 = vld [vmem:[%s438_s3 + $0x20] sm:$0xff]   ;;  %v318_v10 = vld [vmem:[%s438_s3 + $0x18] sm:$0xff]   ;;  %v319_v11 = vld [vmem:[%s438_s3 + $0x10] sm:$0xff]   ;;  %s243_s18 = sshll.u32 %s350_s17, 4  ;;  %s244_s18 = int_to_ptr.vmem [resolvable:$true] %s243_s18 }
   0x9   :  { %284 = vmatmul.mubr.msk.bf16.vlgmr.msra.gmra.mxu0 %vm26_vm1, %v31_v6  ;;  %291 = vmatprep.subr.bf16.mxu1 %v348_v1  ;;  %v320_v12 = vld [vmem:[%s438_s3 + $0x8] sm:$0xff]   ;;  %v321_v13 = vld [vmem:[%s438_s3] sm:$0xff]   ;;  %s326_s19 = scalar_lea.vmem %s244_s18, 256  ;;  %p331_p1 = scmp.lt.s32.totalorder %s244_s18, %s244_s18 }
   0xa   :  { %v254_v14 = vld [vmem:[%s437_s2] ss:$0 sm:$0xff]  ;;  %v127_v36 = vld [vmem:[#allocation2 + $0x8] sm:$0xff]  ;;  %p327_p0 = scmp.ne.s32.totalorder %s244_s18, %s326_s19  ;;  %p332_p2 = scmp.lt.s32.totalorder %s326_s19, %s326_s19 }
   0xb   :  { %v126_v32 = vld [vmem:[#allocation2] sm:$0xff] }
   0xc   :  { %292 = vmatpush3.bf16.msra.mxu1 %v316_v8  ;;  %v266_v40 = vld [vmem:[%s439_s4] ss:$0 sm:$0xff]  ;;  %p333_p3 = por %p332_p2, %p331_p1 }
   0xd   :  { %293 = vmatprep.subr.bf16.mxu1 %v348_v1 }
   0xe   :  { %p334_p4 = pnand %p333_p3, %p327_p0 }
  0x10   :  { %294 = vmatpush3.bf16.msra.mxu1 %v317_v9 }
  0x11   :  { %295 = vmatprep.subr.bf16.mxu1 %v348_v1 }
  0x14   :  { %296 = vmatpush3.bf16.msra.mxu1 %v318_v10 }
  0x15   :  { %297 = vmatprep.subr.bf16.mxu1 %v348_v1 }
  0x18   :  { %298 = vmatpush3.bf16.msra.mxu1 %v319_v11 }
  0x19   :  { %299 = vmatprep.subr.bf16.mxu1 %v348_v1 }
  0x1c   :  { %300 = vmatpush3.bf16.msra.mxu1 %v320_v12 }
  0x1d   :  { %301 = vmatprep.subr.bf16.mxu1 %v348_v1 }
  0x20   :  { %302 = vmatpush3.bf16.msra.mxu1 %v321_v13 }
  0xc9   :  { %v109_v15 = vpop.f32.mrf.mxu0 }
  0xca   :  { %v110_v16 = vadd.f32 %v254_v14, %v109_v15 }
  0xcb   :  { %v285_v17 = vpop.f32.mrf.mxu0 }
  0xcc   :  { %v118_v18 = vmul.f32 0.70710677, %v110_v16  ;;  %v116_v26 = vmul.f32 0.5, %v110_v16 }
  0xcd   :  { %v112_v19 = vpop.f32.mrf.mxu0 }
  0xce   :  { %322 = verf.f32 %v118_v18  ;;  %v113_v20 = vadd.f32 %v254_v14, %v112_v19 }
  0xcf   :  { %v286_v21 = vpop.f32.mrf.mxu0 }
  0xd0   :  { %v119_v22 = vmul.f32 0.70710677, %v113_v20  ;;  %v117_v27 = vmul.f32 0.5, %v113_v20 }
  0xd2   :  { %324 = verf.f32 %v119_v22 }
  0xdb   :  { %v323_v23 = vpop.eup %322 }
  0xdc   :  { %v122_v24 = vadd.f32 1.0, %v323_v23 }
  0xde   :  { %v124_v29 = vmul.f32 %v122_v24, %v116_v26 }
  0xdf   :  { %v325_v25 = vpop.eup %324 }
  0xe0   :  { %v123_v28 = vadd.f32 1.0, %v325_v25 }
  0xe2   :  { %v125_v30 = vmul.f32 %v123_v28, %v117_v27 }
  0xe4   :  { %v128_v31 = vpack.c.bf16 %v125_v30, %v124_v29 }
  0xe6   :  { %304 = vmatmul.mubr.bf16.vlgmr.msra.gmra.mxu1 %v128_v31 }
 0x1a6   :  { %v211_v33 = vpop.f32.mrf.mxu1 }
 0x1a7   :  { %v218_v34 = vadd.f32 %v211_v33, %v126_v32 }
 0x1a8   :  { %v305_v35 = vpop.f32.mrf.mxu1 }
 0x1a9   :  { %220 = vst.msk [vmem:[#allocation2] sm:$0xff] %vm26_vm1, %v218_v34 }
 0x1aa   :  { %v214_v37 = vpop.f32.mrf.mxu1 }
 0x1ab   :  { %v219_v38 = vadd.f32 %v214_v37, %v127_v36 }
 0x1ac   :  { %v306_v39 = vpop.f32.mrf.mxu1 }
 0x1ad   :  { %221 = vst.msk [vmem:[#allocation2 + $0x8] sm:$0xff] %vm26_vm1, %v219_v38 }
 0x1b0   :  { %v225_v41 = vld [vmem:[#allocation2] sm:$0xff] }
 0x1b1   :  { %v234_v42 = vadd.f32 %v266_v40, %v225_v41 }
 0x1b3   :  { %236 = vst.msk [vmem:[#allocation3] sm:$0xff] %vm26_vm1, %v234_v42 }
 0x1b4   :  { %v226_v43 = vld [vmem:[#allocation2 + $0x8] sm:$0xff] }
 0x1b5   :  { %v235_v44 = vadd.f32 %v266_v40, %v226_v43 }
 0x1b7   :  { %237 = vst.msk [vmem:[#allocation3 + $0x8] sm:$0xff] %vm26_vm1, %v235_v44 }
 0x1b8   :  { %337 = shalt.err (!%p334_p4)
}
 0x1b9   :  { %s351_s20 = smov 128   ;;  %s352_s4 = smov 8  }
 0x1ba   :  { %249 = dma.vmem_to_hbm [thread:$0]  %s244_s18, 256, %s440_s5, [#allocation4], %s351_s20, %s351_s20, %s352_s4  }
 0x1bb   :  { %346 = dma.done.wait [#allocation4], 256  }
 0x1bc   :  { %347 = vsyncadd [#allocation4], 4294967040 }
 0x1bd   :  { %253 = vsyncpa [#allocation4], 1 }

</bundles_post_ra>
